<compile_context>
chip_gen: v6e
topology: v6e:2x2x1
jax: 0.10.0
libtpu: 0.0.40
codegen_flags: <defaults>
</compile_context>

<pallas_src>
import functools

import jax
import jax.numpy as jnp
from jax.experimental import pallas as pl
from jax.experimental.pallas import tpu as pltpu

HIDDEN = 256
LANE = 128


def _fcnet1_kernel(x_ref,
                   w1_ref, b1_ref,
                   w2_ref, b2_ref,
                   w3_ref, b3_ref,
                   w4_ref, b4_ref,
                   o_ref):
    """Fused 4-layer MLP: (Linear -> ReLU) x 4. bf16 matmuls, f32 accum/epilogue."""
    h = x_ref[...]  # bf16 [block_b, D_in]

    # Layer 1
    a = jnp.dot(h, w1_ref[...], preferred_element_type=jnp.float32)
    a = jnp.maximum(a + b1_ref[...], 0.0)
    h = a.astype(jnp.bfloat16)

    # Layer 2
    a = jnp.dot(h, w2_ref[...], preferred_element_type=jnp.float32)
    a = jnp.maximum(a + b2_ref[...], 0.0)
    h = a.astype(jnp.bfloat16)

    # Layer 3
    a = jnp.dot(h, w3_ref[...], preferred_element_type=jnp.float32)
    a = jnp.maximum(a + b3_ref[...], 0.0)
    h = a.astype(jnp.bfloat16)

    # Layer 4 (FCNet1 applies ReLU after the final Linear as well)
    a = jnp.dot(h, w4_ref[...], preferred_element_type=jnp.float32)
    a = jnp.maximum(a + b4_ref[...], 0.0)

    o_ref[...] = a.astype(o_ref.dtype)


def _round_up(n, m):
    return ((n + m - 1) // m) * m


def _pick_block_b(batch):
    """Batch-tile width.

    * batch <= 256 : one full-extent tile (always legal, zero padding).
    * 256 < batch  : 2-way even split (both v7x TensorCores busy), capped at 512
                     (512-wide tiles already reach ~85% of HBM roofline; bigger
                     only inflates f32 intermediate spill, hurting v5e).
    """
    if batch <= 256:
        return batch
    return min(512, _round_up(pl.cdiv(batch, 2), 16))


@functools.partial(jax.jit, static_argnames=("block_b", "out_dtype"))
def fcnet1_forward(x, params, block_b=None, out_dtype=jnp.bfloat16):
    """x: [B, input_size] float32.

    params: w1..w4 bf16 [in, out], b1..b4 f32 [1, out].
    out_dtype: bf16 by default (halves the dominant HBM stream on v6e/v7x); pass
    jnp.float32 if downstream consumers need f32.
    """
    B, D_in = x.shape

    w1, b1 = params["w1"], params["b1"]
    w2, b2 = params["w2"], params["b2"]
    w3, b3 = params["w3"], params["b3"]
    w4, b4 = params["w4"], params["b4"]

    # Lane-align K for layer 1 when input_size is not a multiple of 128.
    # (Zero pad is numerically free; prefer pre-padded params/inputs in production.)
    if D_in % LANE != 0:
        pad_k = _round_up(D_in, LANE) - D_in
        x = jnp.pad(x, ((0, 0), (0, pad_k)))
        w1 = jnp.pad(w1, ((0, pad_k), (0, 0)))
        D_in = D_in + pad_k

    if block_b is None:
        block_b = _pick_block_b(B)
    assert block_b % 8 == 0 or block_b == B, "block_b must be sublane-aligned or full-extent"

    x_bf16 = x.astype(jnp.bfloat16)

    # No batch padding / output slicing: a ragged last tile is handled by Pallas
    # boundary masking (row-independent compute, masked writeback).
    num_blocks = pl.cdiv(B, block_b)
    grid = (num_blocks,)

    # x/out tiled over batch; weights & biases use constant index maps so they are
    # fetched once and stay resident in VMEM for the whole grid.
    x_spec = pl.BlockSpec((block_b, D_in), lambda i: (i, 0))
    w_in_spec = pl.BlockSpec((D_in, HIDDEN), lambda i: (0, 0))
    w_spec = pl.BlockSpec((HIDDEN, HIDDEN), lambda i: (0, 0))
    b_spec = pl.BlockSpec((1, HIDDEN), lambda i: (0, 0))
    o_spec = pl.BlockSpec((block_b, HIDDEN), lambda i: (i, 0))

    out_itemsize = jnp.dtype(out_dtype).itemsize
    flops = 2 * B * (D_in * HIDDEN + 3 * HIDDEN * HIDDEN)
    bytes_accessed = (
        B * D_in * 2                                  # x (bf16)
        + (D_in * HIDDEN + 3 * HIDDEN * HIDDEN) * 2   # weights (bf16)
        + 4 * HIDDEN * 4                              # biases (f32)
        + B * HIDDEN * out_itemsize                   # output
    )

    out = pl.pallas_call(
        _fcnet1_kernel,
        out_shape=jax.ShapeDtypeStruct((B, HIDDEN), out_dtype),
        grid_spec=pltpu.PrefetchScalarGridSpec(
            num_scalar_prefetch=0,
            grid=grid,
            in_specs=[x_spec,
                      w_in_spec, b_spec,
                      w_spec, b_spec,
                      w_spec, b_spec,
                      w_spec, b_spec],
            out_specs=o_spec,
        ),
        compiler_params=pltpu.CompilerParams(
            dimension_semantics=("parallel",)),
        cost_estimate=pl.CostEstimate(
            flops=flops, transcendentals=0, bytes_accessed=bytes_accessed),
    )(x_bf16, w1, b1, w2, b2, w3, b3, w4, b4)

    return out


def init_params(key, input_size):
    """nn.Linear-style init U(-1/sqrt(fan_in), 1/sqrt(fan_in)); weights cast to bf16."""
    params = {}
    dims = [(input_size, HIDDEN), (HIDDEN, HIDDEN), (HIDDEN, HIDDEN), (HIDDEN, HIDDEN)]
    for idx, (fan_in, fan_out) in enumerate(dims, start=1):
        key, kw, kb = jax.random.split(key, 3)
        bound = 1.0 / jnp.sqrt(float(fan_in))
        # stored as [in, out] (transpose of PyTorch's [out, in]) so kernel does x @ W
        w = jax.random.uniform(kw, (fan_in, fan_out), jnp.float32,
                               minval=-bound, maxval=bound)
        b = jax.random.uniform(kb, (1, fan_out), jnp.float32,
                               minval=-bound, maxval=bound)
        params[f"w{idx}"] = w.astype(jnp.bfloat16)
        params[f"b{idx}"] = b  # bias stays f32 (f32 epilogue)
    return params


def reference_forward(x, params):
    """Pure-JAX reference mirroring the kernel's dataflow (bf16 matmuls, f32 accum).

    Note: a true f32 PyTorch FCNet1 would differ slightly from this bf16 dataflow;
    this reference validates the kernel, not f32 parity.
    """
    h = x.astype(jnp.bfloat16)
    a = None
    for idx in range(1, 5):
        a = jnp.dot(h, params[f"w{idx}"], preferred_element_type=jnp.float32)
        a = jnp.maximum(a + params[f"b{idx}"], 0.0)
        h = a.astype(jnp.bfloat16)
    return a  # final output in f32


if __name__ == "__main__":
    key = jax.random.PRNGKey(0)
    input_size = 128   # lane-aligned K for layer 1

    kx, kp, kx2 = jax.random.split(key, 3)
    params = init_params(kp, input_size)

    # Small demo batch: single full-extent tile, no padding, no slicing.
    batch = 8
    x = jax.random.normal(kx, (batch, input_size), jnp.float32)
    out = jax.block_until_ready(fcnet1_forward(x, params))
    ref = reference_forward(x, params)
    assert out.shape == (batch, HIDDEN)
    assert jnp.allclose(out.astype(jnp.float32), ref, atol=2e-2, rtol=2e-2), (
        float(jnp.max(jnp.abs(out.astype(jnp.float32) - ref))))

    # Medium batch: exercises the 2-tile "parallel" grid (block_b = 320, 2 steps).
    batch2 = 640
    x2 = jax.random.normal(kx2, (batch2, input_size), jnp.float32)
    out2 = jax.block_until_ready(fcnet1_forward(x2, params))
    ref2 = reference_forward(x2, params)
    assert out2.shape == (batch2, HIDDEN)
    assert jnp.allclose(out2.astype(jnp.float32), ref2, atol=2e-2, rtol=2e-2), (
        float(jnp.max(jnp.abs(out2.astype(jnp.float32) - ref2))))

    print("KERNEL_OK")
</pallas_src>

<mosaic_0001>
module attributes {stable_mosaic.version = 11 : i64} {
  func.func @_fcnet1_kernel(%arg0: i32, %arg1: memref<8x128xbf16, #tpu.memory_space<vmem>>, %arg2: memref<128x256xbf16, #tpu.memory_space<vmem>>, %arg3: memref<1x256xf32, #tpu.memory_space<vmem>>, %arg4: memref<256x256xbf16, #tpu.memory_space<vmem>>, %arg5: memref<1x256xf32, #tpu.memory_space<vmem>>, %arg6: memref<256x256xbf16, #tpu.memory_space<vmem>>, %arg7: memref<1x256xf32, #tpu.memory_space<vmem>>, %arg8: memref<256x256xbf16, #tpu.memory_space<vmem>>, %arg9: memref<1x256xf32, #tpu.memory_space<vmem>>, %arg10: memref<8x256xbf16, #tpu.memory_space<vmem>>) attributes {dimension_semantics = [#tpu.dimension_semantics<parallel>], iteration_bounds = array<i64: 1>, scalar_prefetch = 0 : i64, scratch_operands = 0 : i64, tpu.core_type = #tpu.core_type<tc>, window_params = [{transform_indices = @transform_0, window_bounds = array<i64: 8, 128>}, {pipeline_mode = #tpu.pipeline_mode<synchronous>, transform_indices = @transform_1, window_bounds = array<i64: 128, 256>}, {pipeline_mode = #tpu.pipeline_mode<synchronous>, transform_indices = @transform_2, window_bounds = array<i64: 1, 256>}, {pipeline_mode = #tpu.pipeline_mode<synchronous>, transform_indices = @transform_3, window_bounds = array<i64: 256, 256>}, {pipeline_mode = #tpu.pipeline_mode<synchronous>, transform_indices = @transform_4, window_bounds = array<i64: 1, 256>}, {pipeline_mode = #tpu.pipeline_mode<synchronous>, transform_indices = @transform_5, window_bounds = array<i64: 256, 256>}, {pipeline_mode = #tpu.pipeline_mode<synchronous>, transform_indices = @transform_6, window_bounds = array<i64: 1, 256>}, {pipeline_mode = #tpu.pipeline_mode<synchronous>, transform_indices = @transform_7, window_bounds = array<i64: 256, 256>}, {pipeline_mode = #tpu.pipeline_mode<synchronous>, transform_indices = @transform_8, window_bounds = array<i64: 1, 256>}, {transform_indices = @transform_9, window_bounds = array<i64: 8, 256>}]} {
    %c0 = arith.constant 0 : index
    %c0_0 = arith.constant 0 : index
    %0 = vector.load %arg1[%c0, %c0_0] : memref<8x128xbf16, #tpu.memory_space<vmem>>, vector<8x128xbf16>
    %c0_1 = arith.constant 0 : index
    %c0_2 = arith.constant 0 : index
    %1 = vector.load %arg2[%c0_1, %c0_2] : memref<128x256xbf16, #tpu.memory_space<vmem>>, vector<128x256xbf16>
    %cst = arith.constant dense<0.000000e+00> : vector<8x256xf32>
    %2 = tpu.matmul %0, %1, %cst {dimension_numbers = #tpu.dot_dimension_numbers<[1], [0], [0], [1], [0, 0, 1, 1], [], []>} : vector<8x128xbf16>, vector<128x256xbf16>, vector<8x256xf32> -> vector<8x256xf32>
    %c0_3 = arith.constant 0 : index
    %c0_4 = arith.constant 0 : index
    %3 = vector.load %arg3[%c0_3, %c0_4] : memref<1x256xf32, #tpu.memory_space<vmem>>, vector<1x256xf32>
    %4 = vector.broadcast %3 : vector<1x256xf32> to vector<8x256xf32>
    %5 = arith.addf %2, %4 : vector<8x256xf32>
    %cst_5 = arith.constant 0.000000e+00 : f32
    %6 = vector.broadcast %cst_5 : f32 to vector<8x256xf32>
    %7 = arith.maximumf %5, %6 : vector<8x256xf32>
    %8 = arith.truncf %7 : vector<8x256xf32> to vector<8x256xbf16>
    %c0_6 = arith.constant 0 : index
    %c0_7 = arith.constant 0 : index
    %9 = vector.load %arg4[%c0_6, %c0_7] : memref<256x256xbf16, #tpu.memory_space<vmem>>, vector<256x256xbf16>
    %cst_8 = arith.constant dense<0.000000e+00> : vector<8x256xf32>
    %10 = tpu.matmul %8, %9, %cst_8 {dimension_numbers = #tpu.dot_dimension_numbers<[1], [0], [0], [1], [0, 0, 1, 1], [], []>} : vector<8x256xbf16>, vector<256x256xbf16>, vector<8x256xf32> -> vector<8x256xf32>
    %c0_9 = arith.constant 0 : index
    %c0_10 = arith.constant 0 : index
    %11 = vector.load %arg5[%c0_9, %c0_10] : memref<1x256xf32, #tpu.memory_space<vmem>>, vector<1x256xf32>
    %12 = vector.broadcast %11 : vector<1x256xf32> to vector<8x256xf32>
    %13 = arith.addf %10, %12 : vector<8x256xf32>
    %cst_11 = arith.constant 0.000000e+00 : f32
    %14 = vector.broadcast %cst_11 : f32 to vector<8x256xf32>
    %15 = arith.maximumf %13, %14 : vector<8x256xf32>
    %16 = arith.truncf %15 : vector<8x256xf32> to vector<8x256xbf16>
    %c0_12 = arith.constant 0 : index
    %c0_13 = arith.constant 0 : index
    %17 = vector.load %arg6[%c0_12, %c0_13] : memref<256x256xbf16, #tpu.memory_space<vmem>>, vector<256x256xbf16>
    %cst_14 = arith.constant dense<0.000000e+00> : vector<8x256xf32>
    %18 = tpu.matmul %16, %17, %cst_14 {dimension_numbers = #tpu.dot_dimension_numbers<[1], [0], [0], [1], [0, 0, 1, 1], [], []>} : vector<8x256xbf16>, vector<256x256xbf16>, vector<8x256xf32> -> vector<8x256xf32>
    %c0_15 = arith.constant 0 : index
    %c0_16 = arith.constant 0 : index
    %19 = vector.load %arg7[%c0_15, %c0_16] : memref<1x256xf32, #tpu.memory_space<vmem>>, vector<1x256xf32>
    %20 = vector.broadcast %19 : vector<1x256xf32> to vector<8x256xf32>
    %21 = arith.addf %18, %20 : vector<8x256xf32>
    %cst_17 = arith.constant 0.000000e+00 : f32
    %22 = vector.broadcast %cst_17 : f32 to vector<8x256xf32>
    %23 = arith.maximumf %21, %22 : vector<8x256xf32>
    %24 = arith.truncf %23 : vector<8x256xf32> to vector<8x256xbf16>
    %c0_18 = arith.constant 0 : index
    %c0_19 = arith.constant 0 : index
    %25 = vector.load %arg8[%c0_18, %c0_19] : memref<256x256xbf16, #tpu.memory_space<vmem>>, vector<256x256xbf16>
    %cst_20 = arith.constant dense<0.000000e+00> : vector<8x256xf32>
    %26 = tpu.matmul %24, %25, %cst_20 {dimension_numbers = #tpu.dot_dimension_numbers<[1], [0], [0], [1], [0, 0, 1, 1], [], []>} : vector<8x256xbf16>, vector<256x256xbf16>, vector<8x256xf32> -> vector<8x256xf32>
    %c0_21 = arith.constant 0 : index
    %c0_22 = arith.constant 0 : index
    %27 = vector.load %arg9[%c0_21, %c0_22] : memref<1x256xf32, #tpu.memory_space<vmem>>, vector<1x256xf32>
    %28 = vector.broadcast %27 : vector<1x256xf32> to vector<8x256xf32>
    %29 = arith.addf %26, %28 : vector<8x256xf32>
    %cst_23 = arith.constant 0.000000e+00 : f32
    %30 = vector.broadcast %cst_23 : f32 to vector<8x256xf32>
    %31 = arith.maximumf %29, %30 : vector<8x256xf32>
    %32 = arith.truncf %31 : vector<8x256xf32> to vector<8x256xbf16>
    %c0_24 = arith.constant 0 : index
    %c0_25 = arith.constant 0 : index
    %33 = vector.load %arg10[%c0_24, %c0_25] : memref<8x256xbf16, #tpu.memory_space<vmem>>, vector<8x256xbf16>
    tpu.vector_store %arg10[%c0_24, %c0_25], %32 {strides = array<i32>} : memref<8x256xbf16, #tpu.memory_space<vmem>>, vector<8x256xbf16>,
    return
  }
  func.func @transform_0(%arg0: i32) -> (i32, i32) {
    %c0_i32 = arith.constant 0 : i32
    %c0_i32_0 = arith.constant 0 : i32
    return %arg0, %c0_i32 : i32, i32
  }
  func.func @transform_1(%arg0: i32) -> (i32, i32) {
    %c0_i32 = arith.constant 0 : i32
    %c0_i32_0 = arith.constant 0 : i32
    %c0_i32_1 = arith.constant 0 : i32
    return %c0_i32, %c0_i32_0 : i32, i32
  }
  func.func @transform_2(%arg0: i32) -> (i32, i32) {
    %c0_i32 = arith.constant 0 : i32
    %c0_i32_0 = arith.constant 0 : i32
    %c0_i32_1 = arith.constant 0 : i32
    return %c0_i32, %c0_i32_0 : i32, i32
  }
  func.func @transform_3(%arg0: i32) -> (i32, i32) {
    %c0_i32 = arith.constant 0 : i32
    %c0_i32_0 = arith.constant 0 : i32
    %c0_i32_1 = arith.constant 0 : i32
    return %c0_i32, %c0_i32_0 : i32, i32
  }
  func.func @transform_4(%arg0: i32) -> (i32, i32) {
    %c0_i32 = arith.constant 0 : i32
    %c0_i32_0 = arith.constant 0 : i32
    %c0_i32_1 = arith.constant 0 : i32
    return %c0_i32, %c0_i32_0 : i32, i32
  }
  func.func @transform_5(%arg0: i32) -> (i32, i32) {
    %c0_i32 = arith.constant 0 : i32
    %c0_i32_0 = arith.constant 0 : i32
    %c0_i32_1 = arith.constant 0 : i32
    return %c0_i32, %c0_i32_0 : i32, i32
  }
  func.func @transform_6(%arg0: i32) -> (i32, i32) {
    %c0_i32 = arith.constant 0 : i32
    %c0_i32_0 = arith.constant 0 : i32
    %c0_i32_1 = arith.constant 0 : i32
    return %c0_i32, %c0_i32_0 : i32, i32
  }
  func.func @transform_7(%arg0: i32) -> (i32, i32) {
    %c0_i32 = arith.constant 0 : i32
    %c0_i32_0 = arith.constant 0 : i32
    %c0_i32_1 = arith.constant 0 : i32
    return %c0_i32, %c0_i32_0 : i32, i32
  }
  func.func @transform_8(%arg0: i32) -> (i32, i32) {
    %c0_i32 = arith.constant 0 : i32
    %c0_i32_0 = arith.constant 0 : i32
    %c0_i32_1 = arith.constant 0 : i32
    return %c0_i32, %c0_i32_0 : i32, i32
  }
  func.func @transform_9(%arg0: i32) -> (i32, i32) {
    %c0_i32 = arith.constant 0 : i32
    %c0_i32_0 = arith.constant 0 : i32
    return %arg0, %c0_i32 : i32, i32
  }
}

</mosaic_0001>

<bundles_post_ra>
// kernel: fcnet1_forward.1
= control target key start
LH: loop header
LB: loop body
LE: loop exit
PB: predicated region body
PF: predicated region fallthrough
CT: control target
= control target key end

     0   :  { %14 = vsyncpa [#allocation3], 0  ;;  %s1524_s0 = inlined_call_operand.vmem [shape: bf16[8,128], index: 0, kind: input, shape index: {}]   ;;  %s1525_s1 = inlined_call_operand.hbm [shape: bf16[128,256], index: 1, kind: input, shape index: {}]   ;;  %s1526_s2 = inlined_call_operand.vmem [shape: f32[1,256], index: 2, kind: input, shape index: {}]   ;;  %s1527_s3 = inlined_call_operand.hbm [shape: bf16[256,256], index: 3, kind: input, shape index: {}]   ;;  %s1528_s4 = inlined_call_operand.vmem [shape: f32[1,256], index: 4, kind: input, shape index: {}]   ;;  %s1529_s5 = inlined_call_operand.hbm [shape: bf16[256,256], index: 5, kind: input, shape index: {}]   ;;  %s1530_s6 = inlined_call_operand.vmem [shape: f32[1,256], index: 6, kind: input, shape index: {}]   ;;  %s1531_s7 = inlined_call_operand.hbm [shape: bf16[256,256], index: 7, kind: input, shape index: {}]   ;;  %s1532_s8 = inlined_call_operand.vmem [shape: f32[1,256], index: 8, kind: input, shape index: {}]   ;;  %s1533_s9 = inlined_call_operand.hbm [shape: bf16[8,256], index: 9, kind: output, shape index: {}]  }
   0x1   :  { %15 = vsyncpa [#allocation6], 0 }
   0x2   :  { %16 = vsyncpa [#allocation9], 0 }
   0x3   :  { %17 = vsyncpa [#allocation4], 0  ;;  %s1412_s30 = smov [#allocation5]   ;;  %s1413_s11 = smov [#allocation2]  }
   0x4   :  { %s39_s10 = sshll.u32 %s1412_s30, 4  ;;  %s25_s12 = sshll.u32 %s1413_s11, 4  ;;  %s40_s10 = int_to_ptr.vmem [resolvable:$true] %s39_s10  ;;  %s26_s12 = int_to_ptr.vmem [resolvable:$true] %s25_s12 }
   0x5   :  { %s1312_s13 = scalar_lea.vmem %s40_s10, 4096  ;;  %p1317_p1 = scmp.lt.s32.totalorder %s40_s10, %s40_s10 }
   0x6   :  { %p1313_p0 = scmp.ne.s32.totalorder %s40_s10, %s1312_s13  ;;  %p1318_p2 = scmp.lt.s32.totalorder %s1312_s13, %s1312_s13 }
   0x8   :  { %p1319_p3 = por %p1318_p2, %p1317_p1 }
   0xa   :  { %p1320_p4 = pnand %p1319_p3, %p1313_p0 }
   0xc   :  { %1323 = shalt.err (!%p1320_p4)
}
   0xd   :  { %s1414_s14 = smov 128   ;;  %s1415_s15 = smov 8  }
   0xe   :  { %45 = dma.hbm_to_vmem [thread:$0]  %s1527_s3, 4096, %s40_s10, [#allocation6], %s1414_s14, %s1414_s14, %s1415_s15  }
   0xf   :  { %s1332_s18 = scalar_lea.vmem %s26_s12, 2048  ;;  %p1337_p6 = scmp.lt.s32.totalorder %s26_s12, %s26_s12 }
  0x10   :  { %p1333_p5 = scmp.ne.s32.totalorder %s26_s12, %s1332_s18  ;;  %p1338_p7 = scmp.lt.s32.totalorder %s1332_s18, %s1332_s18 }
  0x12   :  { %p1339_p8 = por %p1338_p7, %p1337_p6 }
  0x14   :  { %p1340_p9 = pnand %p1339_p8, %p1333_p5 }
  0x16   :  { %1343 = shalt.err (!%p1340_p9)
}
  0x17   :  { %31 = dma.hbm_to_vmem [thread:$0]  %s1525_s1, 2048, %s26_s12, [#allocation3], %s1414_s14, %s1414_s14, %s1415_s15  }
  0x18   :  { %s1416_s21 = smov [#allocation7]   ;;  %s1417_s23 = smov [#allocation8]  }
  0x19   :  { %s53_s22 = sshll.u32 %s1416_s21, 4  ;;  %s67_s24 = sshll.u32 %s1417_s23, 4  ;;  %s54_s22 = int_to_ptr.vmem [resolvable:$true] %s53_s22  ;;  %s68_s24 = int_to_ptr.vmem [resolvable:$true] %s67_s24 }
  0x1a   :  { %s1352_s3 = scalar_lea.vmem %s54_s22, 4096  ;;  %p1357_p11 = scmp.lt.s32.totalorder %s54_s22, %s54_s22 }
  0x1b   :  { %p1353_p10 = scmp.ne.s32.totalorder %s54_s22, %s1352_s3  ;;  %p1358_p12 = scmp.lt.s32.totalorder %s1352_s3, %s1352_s3 }
  0x1d   :  { %p1359_p13 = por %p1358_p12, %p1357_p11 }
  0x1f   :  { %p1360_p0 = pnand %p1359_p13, %p1353_p10 }
  0x21   :  { %1363 = shalt.err (!%p1360_p0)
}
  0x22   :  { %59 = dma.hbm_to_vmem [thread:$0]  %s1529_s5, 4096, %s54_s22, [#allocation6], %s1414_s14, %s1414_s14, %s1415_s15  }
  0x23   :  { %s1372_s1 = scalar_lea.vmem %s68_s24, 4096  ;;  %p1377_p2 = scmp.lt.s32.totalorder %s68_s24, %s68_s24 }
  0x24   :  { %p1373_p1 = scmp.ne.s32.totalorder %s68_s24, %s1372_s1  ;;  %p1378_p3 = scmp.lt.s32.totalorder %s1372_s1, %s1372_s1 }
  0x26   :  { %p1379_p4 = por %p1378_p3, %p1377_p2 }
  0x28   :  { %p1380_p5 = pnand %p1379_p4, %p1373_p1 }
  0x2a   :  { %1383 = shalt.err (!%p1380_p5)
}
  0x2b   :  { %73 = dma.hbm_to_vmem [thread:$0]  %s1531_s7, 4096, %s68_s24, [#allocation9], %s1414_s14, %s1414_s14, %s1415_s15  }
  0x2c   :  { %1404 = dma.done.wait [#allocation3], 2048  }
  0x2d   :  { %1405 = vsyncadd [#allocation3], 4294965248 }
  0x2e   :  { %1406 = dma.done.wait [#allocation6], 8192  }
  0x2f   :  { %1407 = vsyncadd [#allocation6], 4294959104 }
  0x30   :  { %1408 = dma.done.wait [#allocation9], 4096  }
  0x31   :  { %1409 = vsyncadd [#allocation9], 4294963200  ;;  %v1418_v0 = vmov 0   ;;  %v1136_v1 = vld [vmem:[#allocation2 + $0x74] ss:$8 sps:$4 sm:$0xff]  }
  0x32   :  { %230 = vmatprep.mubr.bf16.mxu0 %v1418_v0  ;;  %v1138_v2 = vld [vmem:[#allocation2 + $0x70] ss:$8 sps:$4 sm:$0xff]   ;;  %198 = vmatprep.subr.bf16.mxu0 %v1136_v1  ;;  %v1139_v3 = vld [vmem:[#allocation2 + $0x64] ss:$8 sps:$4 sm:$0xff]   ;;  %v1141_v4 = vld [vmem:[#allocation2 + $0x60] ss:$8 sps:$4 sm:$0xff]  }
  0x33   :  { %199 = vmatpush1.bf16.msra.mxu0 %v1138_v2  ;;  %v1142_v5 = vld [vmem:[#allocation2 + $0x54] ss:$8 sps:$4 sm:$0xff]   ;;  %v1144_v6 = vld [vmem:[#allocation2 + $0x50] ss:$8 sps:$4 sm:$0xff]   ;;  %v1145_v7 = vld [vmem:[#allocation2 + $0x44] ss:$8 sps:$4 sm:$0xff]  }
  0x34   :  { %200 = vmatprep.subr.bf16.mxu0 %v1139_v3  ;;  %v1147_v8 = vld [vmem:[#allocation2 + $0x40] ss:$8 sps:$4 sm:$0xff]   ;;  %v1148_v9 = vld [vmem:[#allocation2 + $0x34] ss:$8 sps:$4 sm:$0xff]   ;;  %v1162_v11 = vld [vmem:[#allocation5 + $0x70] ss:$8 sps:$4 sm:$0xff]  }
  0x35   :  { %v1160_v10 = vld [vmem:[#allocation5 + $0x74] ss:$8 sps:$4 sm:$0xff]   ;;  %v1163_v12 = vld [vmem:[#allocation5 + $0x64] ss:$8 sps:$4 sm:$0xff]   ;;  %v1150_v13 = vld [vmem:[#allocation2 + $0x30] ss:$8 sps:$4 sm:$0xff]  }
  0x36   :  { %447 = vmatprep.subr.bf16.mxu1 %v1160_v10  ;;  %v1165_v14 = vld [vmem:[#allocation5 + $0x60] ss:$8 sps:$4 sm:$0xff]   ;;  %v1166_v15 = vld [vmem:[#allocation5 + $0x54] ss:$8 sps:$4 sm:$0xff]   ;;  %v1151_v16 = vld [vmem:[#allocation2 + $0x24] ss:$8 sps:$4 sm:$0xff]  }
  0x37   :  { %201 = vmatpush1.bf16.msra.mxu0 %v1141_v4  ;;  %448 = vmatpush1.bf16.msra.mxu1 %v1162_v11  ;;  %v1153_v17 = vld [vmem:[#allocation2 + $0x20] ss:$8 sps:$4 sm:$0xff]   ;;  %v1168_v18 = vld [vmem:[#allocation5 + $0x50] ss:$8 sps:$4 sm:$0xff]   ;;  %v1169_v19 = vld [vmem:[#allocation5 + $0x44] ss:$8 sps:$4 sm:$0xff]  }
  0x38   :  { %202 = vmatprep.subr.bf16.mxu0 %v1142_v5  ;;  %449 = vmatprep.subr.bf16.mxu1 %v1163_v12  ;;  %v1154_v20 = vld [vmem:[#allocation2 + $0x14] ss:$8 sps:$4 sm:$0xff]   ;;  %v1156_v21 = vld [vmem:[#allocation2 + $0x10] ss:$8 sps:$4 sm:$0xff]   ;;  %v1171_v22 = vld [vmem:[#allocation5 + $0x40] ss:$8 sps:$4 sm:$0xff]  }
  0x39   :  { %v1172_v23 = vld [vmem:[#allocation5 + $0x34] ss:$8 sps:$4 sm:$0xff]   ;;  %v1157_v24 = vld [vmem:[#allocation2 + $0x4] ss:$8 sps:$4 sm:$0xff]   ;;  %v1159_v25 = vld [vmem:[#allocation2] ss:$8 sps:$4 sm:$0xff]  }
  0x3a   :  { %v1174_v26 = vld [vmem:[#allocation5 + $0x30] ss:$8 sps:$4 sm:$0xff]   ;;  %v1175_v27 = vld [vmem:[#allocation5 + $0x24] ss:$8 sps:$4 sm:$0xff]   ;;  %v89_v28 = vld [vmem:[%s1524_s0] sm:$0xf] }
  0x3b   :  { %203 = vmatpush1.bf16.msra.mxu0 %v1144_v6  ;;  %450 = vmatpush1.bf16.msra.mxu1 %v1165_v14  ;;  %v1177_v29 = vld [vmem:[#allocation5 + $0x20] ss:$8 sps:$4 sm:$0xff]   ;;  %v1178_v30 = vld [vmem:[#allocation5 + $0x14] ss:$8 sps:$4 sm:$0xff]   ;;  %v1180_v31 = vld [vmem:[#allocation5 + $0x10] ss:$8 sps:$4 sm:$0xff]   ;;  %v108_v14 = vlaneseq }
  0x3c   :  { %204 = vmatprep.subr.bf16.mxu0 %v1145_v7  ;;  %451 = vmatprep.subr.bf16.mxu1 %v1166_v15  ;;  %v1181_v32 = vld [vmem:[#allocation5 + $0x4] ss:$8 sps:$4 sm:$0xff]   ;;  %v1183_v33 = vld [vmem:[#allocation5] ss:$8 sps:$4 sm:$0xff]   ;;  %v1184_v34 = vld [vmem:[#allocation5 + $0xf4] ss:$8 sps:$4 sm:$0xff]  }
  0x3d   :  { %v1186_v35 = vld [vmem:[#allocation5 + $0xf0] ss:$8 sps:$4 sm:$0xff]   ;;  %v1187_v36 = vld [vmem:[#allocation5 + $0xe4] ss:$8 sps:$4 sm:$0xff]   ;;  %v1189_v37 = vld [vmem:[#allocation5 + $0xe0] ss:$8 sps:$4 sm:$0xff]  }
  0x3e   :  { %v1190_v38 = vld [vmem:[#allocation5 + $0xd4] ss:$8 sps:$4 sm:$0xff]   ;;  %v1192_v39 = vld [vmem:[#allocation5 + $0xd0] ss:$8 sps:$4 sm:$0xff]   ;;  %v1193_v40 = vld [vmem:[#allocation5 + $0xc4] ss:$8 sps:$4 sm:$0xff]  }
  0x3f   :  { %205 = vmatpush1.bf16.msra.mxu0 %v1147_v8  ;;  %452 = vmatpush1.bf16.msra.mxu1 %v1168_v18  ;;  %v1195_v41 = vld [vmem:[#allocation5 + $0xc0] ss:$8 sps:$4 sm:$0xff]   ;;  %v1196_v42 = vld [vmem:[#allocation5 + $0xb4] ss:$8 sps:$4 sm:$0xff]   ;;  %v1198_v43 = vld [vmem:[#allocation5 + $0xb0] ss:$8 sps:$4 sm:$0xff]  }
  0x40   :  { %206 = vmatprep.subr.bf16.mxu0 %v1148_v9  ;;  %453 = vmatprep.subr.bf16.mxu1 %v1169_v19  ;;  %v1199_v44 = vld [vmem:[#allocation5 + $0xa4] ss:$8 sps:$4 sm:$0xff]   ;;  %v1201_v45 = vld [vmem:[#allocation5 + $0xa0] ss:$8 sps:$4 sm:$0xff]   ;;  %v1202_v46 = vld [vmem:[#allocation5 + $0x94] ss:$8 sps:$4 sm:$0xff]  }
  0x41   :  { %v1204_v47 = vld [vmem:[#allocation5 + $0x90] ss:$8 sps:$4 sm:$0xff]   ;;  %v1205_v48 = vld [vmem:[#allocation5 + $0x84] ss:$8 sps:$4 sm:$0xff]   ;;  %v1207_v49 = vld [vmem:[#allocation5 + $0x80] ss:$8 sps:$4 sm:$0xff]  }
  0x42   :  { %v1208_v50 = vld [vmem:[#allocation7 + $0x70] ss:$8 sps:$4 sm:$0xff]   ;;  %v1210_v51 = vld [vmem:[#allocation7 + $0x74] ss:$8 sps:$4 sm:$0xff]   ;;  %v1213_v52 = vld [vmem:[#allocation7 + $0x64] ss:$8 sps:$4 sm:$0xff]  }
  0x43   :  { %207 = vmatpush1.bf16.msra.mxu0 %v1150_v13  ;;  %454 = vmatpush1.bf16.msra.mxu1 %v1171_v22  ;;  %v1211_v53 = vld [vmem:[#allocation7 + $0x60] ss:$8 sps:$4 sm:$0xff]   ;;  %v1216_v54 = vld [vmem:[#allocation7 + $0x54] ss:$8 sps:$4 sm:$0xff]   ;;  %v1214_v55 = vld [vmem:[#allocation7 + $0x50] ss:$8 sps:$4 sm:$0xff]  }
  0x44   :  { %208 = vmatprep.subr.bf16.mxu0 %v1151_v16  ;;  %455 = vmatprep.subr.bf16.mxu1 %v1172_v23  ;;  %v1219_v56 = vld [vmem:[#allocation7 + $0x44] ss:$8 sps:$4 sm:$0xff]   ;;  %v1217_v57 = vld [vmem:[#allocation7 + $0x40] ss:$8 sps:$4 sm:$0xff]   ;;  %v1222_v58 = vld [vmem:[#allocation7 + $0x34] ss:$8 sps:$4 sm:$0xff]  }
  0x45   :  { %v1220_v59 = vld [vmem:[#allocation7 + $0x30] ss:$8 sps:$4 sm:$0xff]   ;;  %v1225_v60 = vld [vmem:[#allocation7 + $0x24] ss:$8 sps:$4 sm:$0xff]   ;;  %v1223_v61 = vld [vmem:[#allocation7 + $0x20] ss:$8 sps:$4 sm:$0xff]  }
  0x46   :  { %v1228_v62 = vld [vmem:[#allocation7 + $0x14] ss:$8 sps:$4 sm:$0xff]   ;;  %v1226_v63 = vld [vmem:[#allocation7 + $0x10] ss:$8 sps:$4 sm:$0xff]   ;;  %v1231_v0 = vld [vmem:[#allocation7 + $0x4] ss:$8 sps:$4 sm:$0xff]  }
  0x47   :  { %209 = vmatpush1.bf16.msra.mxu0 %v1153_v17  ;;  %456 = vmatpush1.bf16.msra.mxu1 %v1174_v26  ;;  %v1229_v1 = vld [vmem:[#allocation7] ss:$8 sps:$4 sm:$0xff]   ;;  %v1234_v2 = vld [vmem:[#allocation7 + $0xf4] ss:$8 sps:$4 sm:$0xff]   ;;  %v1232_v3 = vld [vmem:[#allocation7 + $0xf0] ss:$8 sps:$4 sm:$0xff]  }
  0x48   :  { %210 = vmatprep.subr.bf16.mxu0 %v1154_v20  ;;  %457 = vmatprep.subr.bf16.mxu1 %v1175_v27  ;;  %v1237_v4 = vld [vmem:[#allocation7 + $0xe4] ss:$8 sps:$4 sm:$0xff]   ;;  %v1235_v5 = vld [vmem:[#allocation7 + $0xe0] ss:$8 sps:$4 sm:$0xff]   ;;  %v1240_v6 = vld [vmem:[#allocation7 + $0xd4] ss:$8 sps:$4 sm:$0xff]  }
  0x49   :  { %v1238_v7 = vld [vmem:[#allocation7 + $0xd0] ss:$8 sps:$4 sm:$0xff]   ;;  %v1243_v8 = vld [vmem:[#allocation7 + $0xc4] ss:$8 sps:$4 sm:$0xff]   ;;  %v1241_v9 = vld [vmem:[#allocation7 + $0xc0] ss:$8 sps:$4 sm:$0xff]  }
  0x4a   :  { %v1246_v10 = vld [vmem:[#allocation7 + $0xb4] ss:$8 sps:$4 sm:$0xff]   ;;  %v1244_v11 = vld [vmem:[#allocation7 + $0xb0] ss:$8 sps:$4 sm:$0xff]   ;;  %v1249_v12 = vld [vmem:[#allocation7 + $0xa4] ss:$8 sps:$4 sm:$0xff]  }
  0x4b   :  { %211 = vmatpush1.bf16.msra.mxu0 %v1156_v21  ;;  %458 = vmatpush1.bf16.msra.mxu1 %v1177_v29  ;;  %v1247_v13 = vld [vmem:[#allocation7 + $0xa0] ss:$8 sps:$4 sm:$0xff]   ;;  %v109_v15 = vshrl.u32 %v108_v14, 7  ;;  %v1303_v14 = vld [vmem:[#allocation8 + $0x84] ss:$8 sps:$4 sm:$0xff]  }
  0x4c   :  { %212 = vmatprep.subr.bf16.mxu0 %v1157_v24  ;;  %459 = vmatprep.subr.bf16.mxu1 %v1178_v30  ;;  %v106_v17 = vld [vmem:[%s1526_s2] sm:$0x3] }
  0x4d   :  { %v1497_v16 = vsub.s32 0, %v109_v15  ;;  %v1502_v18 = vsub.s32 1, %v109_v15  ;;  %v1301_v15 = vld [vmem:[#allocation8 + $0x80] ss:$8 sps:$4 sm:$0xff]  }
  0x4f   :  { %213 = vmatpush1.bf16.msra.mxu0 %v1159_v25  ;;  %460 = vmatpush1.bf16.msra.mxu1 %v1180_v31  ;;  %v111_v19 = vrot.slane %v106_v17, %v1497_v16  ;;  %v115_v20 = vrot.slane %v106_v17, %v1502_v18  ;;  %v1252_v31 = vld [vmem:[#allocation7 + $0x94] ss:$8 sps:$4 sm:$0xff]   ;;  %v524_v17 = vld [vmem:[%s1530_s6] sm:$0x3]  ;;  %s1419_s6 = smov [#allocation10]  }
  0x50   :  { %461 = vmatprep.subr.bf16.mxu1 %v1181_v32  ;;  %696 = vmatprep.subr.bf16.mxu0 %v1210_v51  ;;  %v1250_v32 = vld [vmem:[#allocation7 + $0x90] ss:$8 sps:$4 sm:$0xff]   ;;  %v1282_v51 = vld [vmem:[#allocation8 + $0xf4] ss:$8 sps:$4 sm:$0xff]   ;;  %s1003_s13 = sshll.u32 %s1419_s6, 4  ;;  %s1004_s13 = int_to_ptr.vmem [resolvable:$true] %s1003_s13 }
  0x51   :  { %s1384_s14 = scalar_lea.vmem %s1004_s13, 128  ;;  %p1389_p7 = scmp.lt.s32.totalorder %s1004_s13, %s1004_s13 }
  0x52   :  { %231 = vmatmul.mubr.bf16.vlgmr.msra.gmra.mxu0 %v89_v28  ;;  %p1385_p6 = scmp.ne.s32.totalorder %s1004_s13, %s1384_s14  ;;  %p1390_p8 = scmp.lt.s32.totalorder %s1384_s14, %s1384_s14 }
  0x53   :  { %462 = vmatpush1.bf16.msra.mxu1 %v1183_v33  ;;  %697 = vmatpush1.bf16.msra.mxu0 %v1208_v50  ;;  %v1255_v33 = vld [vmem:[#allocation7 + $0x84] ss:$8 sps:$4 sm:$0xff]   ;;  %v1277_v50 = vld [vmem:[#allocation8] ss:$8 sps:$4 sm:$0xff]  }
  0x54   :  { %463 = vmatprep.subr.bf16.mxu1 %v1184_v34  ;;  %698 = vmatprep.subr.bf16.mxu0 %v1213_v52  ;;  %v1253_v34 = vld [vmem:[#allocation7 + $0x80] ss:$8 sps:$4 sm:$0xff]   ;;  %v1280_v52 = vld [vmem:[#allocation8 + $0xf0] ss:$8 sps:$4 sm:$0xff]   ;;  %p1391_p9 = por %p1390_p8, %p1389_p7 }
  0x56   :  { %p1392_p10 = pnand %p1391_p9, %p1385_p6 }
  0x57   :  { %464 = vmatpush2.bf16.msra.mxu1 %v1186_v35  ;;  %699 = vmatpush1.bf16.msra.mxu0 %v1211_v53  ;;  %v1256_v35 = vld [vmem:[#allocation8 + $0x70] ss:$8 sps:$4 sm:$0xff]   ;;  %v1285_v53 = vld [vmem:[#allocation8 + $0xe4] ss:$8 sps:$4 sm:$0xff]  }
  0x58   :  { %465 = vmatprep.subr.bf16.mxu1 %v1187_v36  ;;  %700 = vmatprep.subr.bf16.mxu0 %v1216_v54  ;;  %v1258_v36 = vld [vmem:[#allocation8 + $0x74] ss:$8 sps:$4 sm:$0xff]   ;;  %v1283_v54 = vld [vmem:[#allocation8 + $0xe0] ss:$8 sps:$4 sm:$0xff]  }
  0x5b   :  { %466 = vmatpush2.bf16.msra.mxu1 %v1189_v37  ;;  %701 = vmatpush1.bf16.msra.mxu0 %v1214_v55  ;;  %v1261_v37 = vld [vmem:[#allocation8 + $0x64] ss:$8 sps:$4 sm:$0xff]   ;;  %v1288_v55 = vld [vmem:[#allocation8 + $0xd4] ss:$8 sps:$4 sm:$0xff]  }
  0x5c   :  { %467 = vmatprep.subr.bf16.mxu1 %v1190_v38  ;;  %702 = vmatprep.subr.bf16.mxu0 %v1219_v56  ;;  %v1259_v38 = vld [vmem:[#allocation8 + $0x60] ss:$8 sps:$4 sm:$0xff]   ;;  %v1286_v56 = vld [vmem:[#allocation8 + $0xd0] ss:$8 sps:$4 sm:$0xff]  }
  0x5f   :  { %468 = vmatpush2.bf16.msra.mxu1 %v1192_v39  ;;  %703 = vmatpush1.bf16.msra.mxu0 %v1217_v57  ;;  %v1264_v39 = vld [vmem:[#allocation8 + $0x54] ss:$8 sps:$4 sm:$0xff]   ;;  %v1291_v57 = vld [vmem:[#allocation8 + $0xc4] ss:$8 sps:$4 sm:$0xff]  }
  0x60   :  { %469 = vmatprep.subr.bf16.mxu1 %v1193_v40  ;;  %704 = vmatprep.subr.bf16.mxu0 %v1222_v58  ;;  %v1262_v40 = vld [vmem:[#allocation8 + $0x50] ss:$8 sps:$4 sm:$0xff]   ;;  %v1289_v58 = vld [vmem:[#allocation8 + $0xc0] ss:$8 sps:$4 sm:$0xff]  }
  0x63   :  { %470 = vmatpush2.bf16.msra.mxu1 %v1195_v41  ;;  %705 = vmatpush1.bf16.msra.mxu0 %v1220_v59  ;;  %v1267_v41 = vld [vmem:[#allocation8 + $0x44] ss:$8 sps:$4 sm:$0xff]   ;;  %v1294_v59 = vld [vmem:[#allocation8 + $0xb4] ss:$8 sps:$4 sm:$0xff]  }
  0x64   :  { %471 = vmatprep.subr.bf16.mxu1 %v1196_v42  ;;  %706 = vmatprep.subr.bf16.mxu0 %v1225_v60  ;;  %v1265_v42 = vld [vmem:[#allocation8 + $0x40] ss:$8 sps:$4 sm:$0xff]   ;;  %v1292_v60 = vld [vmem:[#allocation8 + $0xb0] ss:$8 sps:$4 sm:$0xff]  }
  0x67   :  { %472 = vmatpush2.bf16.msra.mxu1 %v1198_v43  ;;  %707 = vmatpush1.bf16.msra.mxu0 %v1223_v61  ;;  %v1270_v43 = vld [vmem:[#allocation8 + $0x34] ss:$8 sps:$4 sm:$0xff]   ;;  %v1297_v61 = vld [vmem:[#allocation8 + $0xa4] ss:$8 sps:$4 sm:$0xff]  }
  0x68   :  { %473 = vmatprep.subr.bf16.mxu1 %v1199_v44  ;;  %708 = vmatprep.subr.bf16.mxu0 %v1228_v62  ;;  %v1268_v44 = vld [vmem:[#allocation8 + $0x30] ss:$8 sps:$4 sm:$0xff]   ;;  %v1295_v62 = vld [vmem:[#allocation8 + $0xa0] ss:$8 sps:$4 sm:$0xff]  }
  0x6b   :  { %474 = vmatpush2.bf16.msra.mxu1 %v1201_v45  ;;  %709 = vmatpush1.bf16.msra.mxu0 %v1226_v63  ;;  %v1273_v45 = vld [vmem:[#allocation8 + $0x24] ss:$8 sps:$4 sm:$0xff]   ;;  %v275_v63 = vld [vmem:[%s1528_s4] sm:$0x3] }
  0x6c   :  { %475 = vmatprep.subr.bf16.mxu1 %v1202_v46  ;;  %710 = vmatprep.subr.bf16.mxu0 %v1231_v0  ;;  %v1271_v46 = vld [vmem:[#allocation8 + $0x20] ss:$8 sps:$4 sm:$0xff]   ;;  %v280_v0 = vrot.slane %v275_v63, %v1497_v16 }
  0x6f   :  { %476 = vmatpush2.bf16.msra.mxu1 %v1204_v47  ;;  %711 = vmatpush1.bf16.msra.mxu0 %v1229_v1  ;;  %v1276_v47 = vld [vmem:[#allocation8 + $0x14] ss:$8 sps:$4 sm:$0xff]   ;;  %v284_v1 = vrot.slane %v275_v63, %v1502_v18 }
  0x70   :  { %477 = vmatprep.subr.bf16.mxu1 %v1205_v48  ;;  %712 = vmatprep.subr.bf16.mxu0 %v1234_v2  ;;  %v1274_v48 = vld [vmem:[#allocation8 + $0x10] ss:$8 sps:$4 sm:$0xff]  }
  0x73   :  { %478 = vmatpush2.bf16.msra.mxu1 %v1207_v49  ;;  %713 = vmatpush2.bf16.msra.mxu0 %v1232_v3  ;;  %v1279_v49 = vld [vmem:[#allocation8 + $0x4] ss:$8 sps:$4 sm:$0xff]  }
  0x74   :  { %714 = vmatprep.subr.bf16.mxu0 %v1237_v4  ;;  %945 = vmatprep.subr.bf16.mxu1 %v1258_v36 }
  0x77   :  { %715 = vmatpush2.bf16.msra.mxu0 %v1235_v5 }
  0x78   :  { %716 = vmatprep.subr.bf16.mxu0 %v1240_v6 }
  0x7b   :  { %717 = vmatpush2.bf16.msra.mxu0 %v1238_v7 }
  0x7c   :  { %718 = vmatprep.subr.bf16.mxu0 %v1243_v8 }
  0x7f   :  { %719 = vmatpush2.bf16.msra.mxu0 %v1241_v9 }
  0x80   :  { %720 = vmatprep.subr.bf16.mxu0 %v1246_v10 }
  0x83   :  { %721 = vmatpush2.bf16.msra.mxu0 %v1244_v11 }
  0x84   :  { %722 = vmatprep.subr.bf16.mxu0 %v1249_v12  ;;  %v1300_v12 = vld [vmem:[#allocation8 + $0x94] ss:$8 sps:$4 sm:$0xff]  }
  0x87   :  { %723 = vmatpush2.bf16.msra.mxu0 %v1247_v13  ;;  %v1298_v13 = vld [vmem:[#allocation8 + $0x90] ss:$8 sps:$4 sm:$0xff]  }
  0x88   :  { %724 = vmatprep.subr.bf16.mxu0 %v1252_v31  ;;  %v773_v31 = vld [vmem:[%s1532_s8] sm:$0x3] }
  0x8b   :  { %725 = vmatpush2.bf16.msra.mxu0 %v1250_v32  ;;  %v778_v32 = vrot.slane %v773_v31, %v1497_v16 }
  0x8c   :  { %726 = vmatprep.subr.bf16.mxu0 %v1255_v33  ;;  %v782_v33 = vrot.slane %v773_v31, %v1502_v18 }
  0x8f   :  { %727 = vmatpush2.bf16.msra.mxu0 %v1253_v34 }
 0x112   :  { %v232_v21 = vpop.f32.mrf.mxu0 }
 0x113   :  { %v233_v22 = vadd.f32 %v232_v21, %v111_v19  ;;  %v529_v19 = vrot.slane %v524_v17, %v1497_v16 }
 0x114   :  { %v234_v23 = vpop.f32.mrf.mxu0 }
 0x115   :  { %v235_v24 = vadd.f32 %v234_v23, %v115_v20  ;;  %v239_v25 = vmax.f32 %v233_v22, 0.0  ;;  %v533_v20 = vrot.slane %v524_v17, %v1502_v18 }
 0x116   :  { %v236_v26 = vpop.f32.mrf.mxu0 }
 0x117   :  { %v240_v27 = vmax.f32 %v235_v24, 0.0  ;;  %v241_v30 = vpack.c.bf16 %v239_v25, %v239_v25 }
 0x118   :  { %v237_v28 = vpop.f32.mrf.mxu0 }
 0x119   :  { %v242_v29 = vpack.c.bf16 %v240_v27, %v240_v27 }
 0x11b   :  { %479 = vmatprep.mubr.bf16.mxu1 %v242_v29 }
 0x11c   :  { %480 = vmatmul.mubr.bf16.vlgmr.msra.gmra.mxu1 %v241_v30 }
 0x11d   :  { %946 = vmatpush1.bf16.msra.mxu1 %v1256_v35 }
 0x11e   :  { %947 = vmatprep.subr.bf16.mxu1 %v1261_v37 }
 0x121   :  { %948 = vmatpush1.bf16.msra.mxu1 %v1259_v38 }
 0x122   :  { %949 = vmatprep.subr.bf16.mxu1 %v1264_v39 }
 0x125   :  { %950 = vmatpush1.bf16.msra.mxu1 %v1262_v40 }
 0x126   :  { %951 = vmatprep.subr.bf16.mxu1 %v1267_v41 }
 0x129   :  { %952 = vmatpush1.bf16.msra.mxu1 %v1265_v42 }
 0x12a   :  { %953 = vmatprep.subr.bf16.mxu1 %v1270_v43 }
 0x12d   :  { %954 = vmatpush1.bf16.msra.mxu1 %v1268_v44 }
 0x12e   :  { %955 = vmatprep.subr.bf16.mxu1 %v1273_v45 }
 0x131   :  { %956 = vmatpush1.bf16.msra.mxu1 %v1271_v46 }
 0x132   :  { %957 = vmatprep.subr.bf16.mxu1 %v1276_v47 }
 0x135   :  { %958 = vmatpush1.bf16.msra.mxu1 %v1274_v48 }
 0x136   :  { %959 = vmatprep.subr.bf16.mxu1 %v1279_v49 }
 0x139   :  { %960 = vmatpush1.bf16.msra.mxu1 %v1277_v50 }
 0x13a   :  { %961 = vmatprep.subr.bf16.mxu1 %v1282_v51 }
 0x13d   :  { %962 = vmatpush2.bf16.msra.mxu1 %v1280_v52 }
 0x13e   :  { %963 = vmatprep.subr.bf16.mxu1 %v1285_v53 }
 0x141   :  { %964 = vmatpush2.bf16.msra.mxu1 %v1283_v54 }
 0x142   :  { %965 = vmatprep.subr.bf16.mxu1 %v1288_v55 }
 0x145   :  { %966 = vmatpush2.bf16.msra.mxu1 %v1286_v56 }
 0x146   :  { %967 = vmatprep.subr.bf16.mxu1 %v1291_v57 }
 0x149   :  { %968 = vmatpush2.bf16.msra.mxu1 %v1289_v58 }
 0x14a   :  { %969 = vmatprep.subr.bf16.mxu1 %v1294_v59 }
 0x14d   :  { %970 = vmatpush2.bf16.msra.mxu1 %v1292_v60 }
 0x14e   :  { %971 = vmatprep.subr.bf16.mxu1 %v1297_v61 }
 0x151   :  { %972 = vmatpush2.bf16.msra.mxu1 %v1295_v62 }
 0x152   :  { %973 = vmatprep.subr.bf16.mxu1 %v1300_v12 }
 0x155   :  { %974 = vmatpush2.bf16.msra.mxu1 %v1298_v13 }
 0x156   :  { %975 = vmatprep.subr.bf16.mxu1 %v1303_v14 }
 0x159   :  { %976 = vmatpush2.bf16.msra.mxu1 %v1301_v15 }
 0x1dc   :  { %v481_v2 = vpop.f32.mrf.mxu1 }
 0x1dd   :  { %v482_v3 = vadd.f32 %v481_v2, %v280_v0 }
 0x1de   :  { %v483_v4 = vpop.f32.mrf.mxu1 }
 0x1df   :  { %v484_v5 = vadd.f32 %v483_v4, %v284_v1  ;;  %v488_v6 = vmax.f32 %v482_v3, 0.0 }
 0x1e0   :  { %v485_v7 = vpop.f32.mrf.mxu1 }
 0x1e1   :  { %v489_v8 = vmax.f32 %v484_v5, 0.0  ;;  %v490_v11 = vpack.c.bf16 %v488_v6, %v488_v6 }
 0x1e2   :  { %v486_v9 = vpop.f32.mrf.mxu1 }
 0x1e3   :  { %v491_v10 = vpack.c.bf16 %v489_v8, %v489_v8 }
 0x1e5   :  { %728 = vmatprep.mubr.bf16.mxu0 %v491_v10 }
 0x1e6   :  { %729 = vmatmul.mubr.bf16.vlgmr.msra.gmra.mxu0 %v490_v11 }
 0x2a6   :  { %v730_v21 = vpop.f32.mrf.mxu0 }
 0x2a7   :  { %v731_v22 = vadd.f32 %v730_v21, %v529_v19 }
 0x2a8   :  { %v732_v23 = vpop.f32.mrf.mxu0 }
 0x2a9   :  { %v733_v24 = vadd.f32 %v732_v23, %v533_v20  ;;  %v737_v25 = vmax.f32 %v731_v22, 0.0 }
 0x2aa   :  { %v734_v26 = vpop.f32.mrf.mxu0 }
 0x2ab   :  { %v738_v27 = vmax.f32 %v733_v24, 0.0  ;;  %v739_v30 = vpack.c.bf16 %v737_v25, %v737_v25 }
 0x2ac   :  { %v735_v28 = vpop.f32.mrf.mxu0 }
 0x2ad   :  { %v740_v29 = vpack.c.bf16 %v738_v27, %v738_v27 }
 0x2af   :  { %977 = vmatprep.mubr.bf16.mxu1 %v740_v29 }
 0x2b0   :  { %978 = vmatmul.mubr.bf16.vlgmr.msra.gmra.mxu1 %v739_v30 }
 0x370   :  { %v979_v34 = vpop.f32.mrf.mxu1 }
 0x371   :  { %v980_v35 = vadd.f32 %v979_v34, %v778_v32 }
 0x372   :  { %v981_v36 = vpop.f32.mrf.mxu1 }
 0x373   :  { %v982_v37 = vadd.f32 %v981_v36, %v782_v33  ;;  %v986_v39 = vmax.f32 %v980_v35, 0.0 }
 0x374   :  { %v983_v38 = vpop.f32.mrf.mxu1 }
 0x375   :  { %v987_v40 = vmax.f32 %v982_v37, 0.0 }
 0x376   :  { %v984_v41 = vpop.f32.mrf.mxu1 }
 0x377   :  { %v1127_v42 = vpack.c.bf16 %v987_v40, %v986_v39 }
 0x379   :  { %996 = vst [vmem:[#allocation10] sm:$0xff] %v1127_v42 }
 0x37a   :  { %1395 = shalt.err (!%p1392_p10)
}
 0x37b   :  { %1006 = dma.vmem_to_hbm [thread:$0]  %s1004_s13, 128, %s1533_s9, [#allocation4]  }
 0x37c   :  { %1410 = dma.done.wait [#allocation4], 128  }
 0x37d   :  { %1411 = vsyncadd [#allocation4], 4294967168 }
 0x37e   :  { %1010 = vsyncpa [#allocation3], 1 }
 0x37f   :  { %1011 = vsyncpa [#allocation6], 1 }
 0x380   :  { %1012 = vsyncpa [#allocation9], 1 }
 0x381   :  { %1013 = vsyncpa [#allocation4], 1 }

</bundles_post_ra>
